<compile_context>
chip_gen: v5e
topology: v5e:2x2
jax: 0.10.0
libtpu: 0.0.40
codegen_flags: <defaults>
</compile_context>

<pallas_src>
import functools

import jax
import jax.numpy as jnp
from jax.experimental import pallas as pl
from jax.experimental.pallas import tpu as pltpu

_LANE = 128
_SUBLANE = 8
_SUB_ROWS = 512          # in-kernel compute sub-tile: 512*128*4B = 256 KiB/operand


def _round_up(x, m):
    return ((x + m - 1) // m) * m


@functools.lru_cache(maxsize=None)
def _per_input_block_bytes():
    """Per-input DMA block size, TPU-generation dependent.

    This kernel is HBM-streaming bound; bigger blocks amortize the ~0.35 us
    fixed per-grid-step overhead.  v7x (64 MiB VMEM/TC, 3.2 TB/s HBM): 8 MiB
    per input.  v5e/v6e (128 MiB VMEM): 4 MiB per input.  In-kernel sub-tiling
    keeps compute temporaries bounded regardless of block size.
    """
    try:
        info = pltpu.get_tpu_info()
        vmem_cap = int(getattr(info, "vmem_capacity_bytes", 128 << 20))
    except Exception:  # no TPU info available at trace time — be conservative
        vmem_cap = 128 << 20
    if vmem_cap <= (80 << 20):   # v7x-class TensorCore (64 MiB VMEM)
        return 8 << 20
    return 4 << 20               # v5e / v6e (128 MiB VMEM)


def _bce_block_kernel(pre_ref, lab_ref, out_ref, *, block_rows, sub_rows,
                      valid_rows, apply_mask):
    """Sum of the (negated-later) BCE core over one (block_rows, 128) block.

    core(p, y) = clamp(log(1-p), -100) + y * (clamp(log p, -100) - clamp(log(1-p), -100))
    torch.nn.BCELoss's per-element loss is -core; the single negation and the
    divide-by-n happen once in the JAX wrapper (saves VALU ops per element).
    """
    i = pl.program_id(0)
    num_sub = block_rows // sub_rows
    # Modest unroll: the body is already ~64 vregs of elementwise work, so loop
    # overhead is <1%; a full unroll would only multiply live VMEM temporaries.
    unroll = 2 if (num_sub % 2 == 0) else 1

    def accumulate(mask):
        def sub_body(j, acc):
            r0 = pl.multiple_of(j * sub_rows, sub_rows)
            p = pre_ref[pl.ds(r0, sub_rows), :].astype(jnp.float32)
            y = lab_ref[pl.ds(r0, sub_rows), :].astype(jnp.float32)
            # torch.nn.BCELoss clamps each log term at -100 BEFORE the
            # y-combine; this clamp-before-combine is also what makes pad
            # elements (p=1, y=1) contribute exactly 0:
            #   -100 + 1*(0 - (-100)) = 0.  Do not reorder.
            log_p = jnp.maximum(jnp.log(p), -100.0)
            log_1mp = jnp.maximum(jnp.log(1.0 - p), -100.0)
            core = log_1mp + y * (log_p - log_1mp)
            if mask:
                # Rows past `valid_rows` (partial last block) hold garbage that
                # may be NaN/inf: select, never multiply.
                row = (jax.lax.broadcasted_iota(jnp.int32, core.shape, 0)
                       + i * block_rows + r0)
                core = jnp.where(row < valid_rows, core, 0.0)
            # (sub_rows, 128) -> (8, 128): pure VPU adds, no cross-lane XLU.
            return acc + jnp.sum(core.reshape(-1, _SUBLANE, _LANE), axis=0)

        acc = jax.lax.fori_loop(
            0, num_sub, sub_body,
            jnp.zeros((_SUBLANE, _LANE), jnp.float32),
            unroll=unroll)
        out_ref[...] = acc[None, :, :]

    if apply_mask:
        # Pay for iota/compare/select only on the (single) partial last block.
        last = pl.num_programs(0) - 1

        @pl.when(i == last)
        def _():
            accumulate(mask=True)

        @pl.when(i != last)
        def _():
            accumulate(mask=False)
    else:
        accumulate(mask=False)


def bce_loss(pre, label):
    """Mean BCE loss, matching torch.nn.BCELoss(reduction='mean')."""
    n = pre.size
    pre_f = pre.reshape(-1)
    lab_f = label.reshape(-1)

    rem = n % _LANE
    if rem:
        # Only sizes that are not a multiple of 128 need padding (<128 pad
        # elements with p=1, y=1, which contribute exactly 0 to the core sum).
        # Multiples of 128 — including every 1024-aligned size — are zero-copy.
        # TODO(synk): this pad still makes one HBM copy of both inputs; a
        # manual pl.ANY-DMA'd tail block would make this case zero-copy too.
        pad = _LANE - rem
        pre_f = jnp.pad(pre_f, (0, pad), constant_values=1)
        lab_f = jnp.pad(lab_f, (0, pad), constant_values=1)

    rows = pre_f.shape[0] // _LANE           # any positive int (mask handles it)
    pre2d = pre_f.reshape(rows, _LANE)
    lab2d = lab_f.reshape(rows, _LANE)

    itemsize = max(pre.dtype.itemsize, label.dtype.itemsize)
    # Compute sub-tile: multiple of 8 rows, at most _SUB_ROWS.
    sub_rows = min(_SUB_ROWS, _round_up(rows, _SUBLANE))
    # DMA block: multiple of sub_rows, sized to the per-generation byte budget.
    budget_rows = _per_input_block_bytes() // (_LANE * itemsize)
    budget_rows = max(sub_rows, (budget_rows // sub_rows) * sub_rows)
    block_rows = min(budget_rows, _round_up(rows, sub_rows))
    num_blocks = pl.cdiv(rows, block_rows)
    apply_mask = (rows % block_rows) != 0    # static (trace-time) choice

    kernel = functools.partial(
        _bce_block_kernel,
        block_rows=block_rows,
        sub_rows=sub_rows,
        valid_rows=rows,
        apply_mask=apply_mask,
    )

    # 2 inputs x 2 pipeline buffers x block + ~1.5 MiB bounded temporaries;
    # 16 MiB headroom keeps this under 64 MiB even with v7x's 8 MiB blocks.
    block_bytes = block_rows * _LANE * itemsize
    vmem_limit = int(2 * 2 * block_bytes + (16 << 20))

    partials = pl.pallas_call(
        kernel,
        out_shape=jax.ShapeDtypeStruct((num_blocks, _SUBLANE, _LANE),
                                       jnp.float32),
        grid_spec=pltpu.PrefetchScalarGridSpec(
            num_scalar_prefetch=0,
            grid=(num_blocks,),
            in_specs=[
                pl.BlockSpec((block_rows, _LANE), lambda i: (i, 0)),
                pl.BlockSpec((block_rows, _LANE), lambda i: (i, 0)),
            ],
            out_specs=pl.BlockSpec((1, _SUBLANE, _LANE), lambda i: (i, 0, 0)),
        ),
        compiler_params=pltpu.CompilerParams(
            # Independent per-block partials: megacore-shardable.
            # TODO(synk): on v7x, confirm via xprof that the grid shards across
            # both TensorCores; if not, switch to CORE_PARALLEL / pl.core_map.
            dimension_semantics=("parallel",),
            vmem_limit_bytes=vmem_limit,
        ),
    )(pre2d, lab2d)

    # loss = -core; single negation + divide by the TRUE element count here.
    return -jnp.sum(partials) / jnp.float32(n)


def bce_loss_module_forward(pre, label, rep_anchor, rep_candidate):
    # rep_anchor / rep_candidate are unused by the PyTorch module's forward.
    del rep_anchor, rep_candidate
    return bce_loss(pre, label)


def _ref_bce(p, y):
    p = p.astype(jnp.float32)
    y = y.astype(jnp.float32)
    return jnp.mean(
        -(y * jnp.maximum(jnp.log(p), -100.0)
          + (1.0 - y) * jnp.maximum(jnp.log(1.0 - p), -100.0)))


if __name__ == "__main__":
    key = jax.random.PRNGKey(0)
    k1, k2, k3, k4 = jax.random.split(key, 4)

    # NCHW-shaped predictions in (0, 1) and binary labels.
    shape = (2, 4, 16, 16)
    pre = jax.nn.sigmoid(jax.random.normal(k1, shape, dtype=jnp.float32))
    label = jax.random.bernoulli(k2, 0.5, shape).astype(jnp.float32)
    rep_anchor = jax.random.normal(k3, (2, 32), dtype=jnp.float32)
    rep_candidate = jax.random.normal(k4, (2, 32), dtype=jnp.float32)

    loss = bce_loss_module_forward(pre, label, rep_anchor, rep_candidate)
    loss = jax.block_until_ready(loss)
    ref = _ref_bce(pre, label)
    assert jnp.allclose(loss, ref, rtol=1e-5, atol=1e-6), (loss, ref)

    # Exercise: (a) the pad path (n % 128 != 0), (b) zero-copy with rows not a
    # multiple of 8 (masked single block), (c) the multi-block path with a
    # partial, masked last block on every TPU generation.
    for extra_shape in [(2, 4, 15, 15), (2, 4, 16, 13), (4, 8, 256, 320)]:
        kp, kl = jax.random.split(jax.random.PRNGKey(sum(extra_shape)), 2)
        p2 = jax.nn.sigmoid(jax.random.normal(kp, extra_shape, dtype=jnp.float32))
        y2 = jax.random.bernoulli(kl, 0.5, extra_shape).astype(jnp.float32)
        got = jax.block_until_ready(bce_loss(p2, y2))
        want = _ref_bce(p2, y2)
        assert jnp.allclose(got, want, rtol=1e-4, atol=1e-6), (
            extra_shape, got, want)

    print("KERNEL_OK")
</pallas_src>

<mosaic_0001>
module attributes {stable_mosaic.version = 11 : i64} {
  func.func @_bce_block_kernel(%arg0: i32, %arg1: memref<16x128xf32, #tpu.memory_space<vmem>>, %arg2: memref<16x128xf32, #tpu.memory_space<vmem>>, %arg3: memref<1x8x128xf32, #tpu.memory_space<vmem>>) attributes {dimension_semantics = [#tpu.dimension_semantics<parallel>], iteration_bounds = array<i64: 1>, scalar_prefetch = 0 : i64, scratch_operands = 0 : i64, tpu.core_type = #tpu.core_type<tc>, window_params = [{transform_indices = @transform_0, window_bounds = array<i64: 16, 128>}, {transform_indices = @transform_1, window_bounds = array<i64: 16, 128>}, {transform_indices = @transform_2, window_bounds = array<i64: 1, 8, 128>}]} {
    %cst = arith.constant 0.000000e+00 : f32
    %0 = vector.broadcast %cst : f32 to vector<8x128xf32>
    %c0_i32 = arith.constant 0 : i32
    %c16_i32 = arith.constant 16 : i32
    %1 = arith.muli %c0_i32, %c16_i32 : i32
    %2 = tpu.assume_multiple %1, 16 : i32
    %3 = arith.index_cast %2 : i32 to index
    %c0 = arith.constant 0 : index
    %4 = vector.load %arg1[%3, %c0] : memref<16x128xf32, #tpu.memory_space<vmem>>, vector<16x128xf32>
    %5 = arith.index_cast %2 : i32 to index
    %c0_0 = arith.constant 0 : index
    %6 = vector.load %arg2[%5, %c0_0] : memref<16x128xf32, #tpu.memory_space<vmem>>, vector<16x128xf32>
    %7 = math.log %4 : vector<16x128xf32>
    %cst_1 = arith.constant -1.000000e+02 : f32
    %8 = vector.broadcast %cst_1 : f32 to vector<16x128xf32>
    %9 = arith.maximumf %7, %8 : vector<16x128xf32>
    %cst_2 = arith.constant 1.000000e+00 : f32
    %10 = vector.broadcast %cst_2 : f32 to vector<16x128xf32>
    %11 = arith.subf %10, %4 : vector<16x128xf32>
    %12 = math.log %11 : vector<16x128xf32>
    %cst_3 = arith.constant -1.000000e+02 : f32
    %13 = vector.broadcast %cst_3 : f32 to vector<16x128xf32>
    %14 = arith.maximumf %12, %13 : vector<16x128xf32>
    %15 = arith.subf %9, %14 : vector<16x128xf32>
    %16 = arith.mulf %6, %15 : vector<16x128xf32>
    %17 = arith.addf %14, %16 : vector<16x128xf32>
    %18 = vector.shape_cast %17 : vector<16x128xf32> to vector<2x8x128xf32>
    %cst_4 = arith.constant dense<0.000000e+00> : vector<8x128xf32>
    %19 = vector.multi_reduction <add>, %18, %cst_4 [0] : vector<2x8x128xf32> to vector<8x128xf32>
    %20 = arith.addf %0, %19 : vector<8x128xf32>
    %c1_i32 = arith.constant 1 : i32
    %21 = vector.shape_cast %20 : vector<8x128xf32> to vector<1x8x128xf32>
    %c0_5 = arith.constant 0 : index
    %c0_6 = arith.constant 0 : index
    %c0_7 = arith.constant 0 : index
    %22 = vector.load %arg3[%c0_5, %c0_6, %c0_7] : memref<1x8x128xf32, #tpu.memory_space<vmem>>, vector<1x8x128xf32>
    tpu.vector_store %arg3[%c0_5, %c0_6, %c0_7], %21 {strides = array<i32>} : memref<1x8x128xf32, #tpu.memory_space<vmem>>, vector<1x8x128xf32>,
    return
  }
  func.func @transform_0(%arg0: i32) -> (i32, i32) {
    %c0_i32 = arith.constant 0 : i32
    %c0_i32_0 = arith.constant 0 : i32
    return %arg0, %c0_i32 : i32, i32
  }
  func.func @transform_1(%arg0: i32) -> (i32, i32) {
    %c0_i32 = arith.constant 0 : i32
    %c0_i32_0 = arith.constant 0 : i32
    return %arg0, %c0_i32 : i32, i32
  }
  func.func @transform_2(%arg0: i32) -> (i32, i32, i32) {
    %c0_i32 = arith.constant 0 : i32
    %c0_i32_0 = arith.constant 0 : i32
    %c0_i32_1 = arith.constant 0 : i32
    return %arg0, %c0_i32, %c0_i32_0 : i32, i32, i32
  }
}

</mosaic_0001>

<bundles_post_ra>
// kernel: tpu_custom_call.1
= control target key start
LH: loop header
LB: loop body
LE: loop exit
PB: predicated region body
PF: predicated region fallthrough
CT: control target
= control target key end

     0   :  { %7 = vsyncpa [#allocation3], 0  ;;  %s209_s0 = inlined_call_operand.hbm [shape: f32[16,128], index: 0, kind: input, shape index: {}]   ;;  %s210_s1 = inlined_call_operand.hbm [shape: f32[16,128], index: 1, kind: input, shape index: {}]   ;;  %s211_s2 = inlined_call_operand.hbm [shape: f32[1,8,128], index: 2, kind: output, shape index: {}]  }
   0x1   :  { %8 = vsyncpa [#allocation6], 0 }
   0x2   :  { %9 = vsyncpa [#allocation4], 0  ;;  %s14_s11 = sshll.u32 %s209_s0, 4  ;;  %s180_s12 = smov [#allocation2]   ;;  %s15_s11 = int_to_ptr.hbm [resolvable:$true] %s14_s11 }
   0x3   :  { %s16_s13 = sshll.u32 %s180_s12, 4  ;;  %s27_s16 = sshll.u32 %s210_s1, 4  ;;  %s17_s13 = int_to_ptr.vmem [resolvable:$true] %s16_s13  ;;  %s28_s16 = int_to_ptr.hbm [resolvable:$true] %s27_s16 }
   0x4   :  { %s181_s17 = smov 128   ;;  %s182_s18 = smov 8  }
   0x5   :  { %22 = dma.hbm_to_vmem [thread:$0]  %s15_s11, 256, %s17_s13, [#allocation3], %s181_s17, %s181_s17, %s182_s18  }
   0x6   :  { %s183_s19 = smov [#allocation5]  }
   0x7   :  { %s29_s20 = sshll.u32 %s183_s19, 4  ;;  %s30_s20 = int_to_ptr.vmem [resolvable:$true] %s29_s20 }
   0x8   :  { %35 = dma.hbm_to_vmem [thread:$0]  %s28_s16, 256, %s30_s20, [#allocation6], %s181_s17, %s181_s17, %s182_s18  }
   0x9   :  { %174 = dma.done.wait [#allocation3], 256  }
   0xa   :  { %175 = vsyncadd [#allocation3], 4294967040 }
   0xb   :  { %176 = dma.done.wait [#allocation6], 256  }
   0xc   :  { %177 = vsyncadd [#allocation6], 4294967040  ;;  %v44_v0 = vld [vmem:[#allocation2] sm:$0xff]  ;;  %v45_v1 = vld [vmem:[#allocation2 + $0x8] sm:$0xff]  ;;  %s184_s0 = smov [#allocation7]   ;;  %s78_s23 = sshll.u32 %s211_s2, 4  ;;  %s79_s23 = int_to_ptr.hbm [resolvable:$true] %s78_s23 }
   0xd   :  { %94 = vlog2.f32 %v44_v0  ;;  %v54_v2 = vsub.f32 1.0, %v44_v0  ;;  %v55_v3 = vsub.f32 1.0, %v45_v1  ;;  %v46_v15 = vld [vmem:[#allocation5] sm:$0xff]  ;;  %v47_v17 = vld [vmem:[#allocation5 + $0x8] sm:$0xff]  ;;  %s76_s1 = sshll.u32 %s184_s0, 4  ;;  %s77_s1 = int_to_ptr.vmem [resolvable:$true] %s76_s1 }
   0xe   :  { %96 = vlog2.f32 %v45_v1 }
   0xf   :  { %98 = vlog2.f32 %v54_v2 }
  0x10   :  { %100 = vlog2.f32 %v55_v3 }
  0x13   :  { %v95_v4 = vpop.eup %94 }
  0x14   :  { %v97_v5 = vpop.eup %96  ;;  %v49_v6 = vmul.f32 0.6931472, %v95_v4 }
  0x15   :  { %v99_v7 = vpop.eup %98  ;;  %v51_v8 = vmul.f32 0.6931472, %v97_v5 }
  0x16   :  { %v101_v9 = vpop.eup %100  ;;  %v52_v10 = vmax.f32 %v49_v6, -100.0  ;;  %v57_v11 = vmul.f32 0.6931472, %v99_v7 }
  0x17   :  { %v53_v12 = vmax.f32 %v51_v8, -100.0  ;;  %v59_v13 = vmul.f32 0.6931472, %v101_v9 }
  0x18   :  { %v60_v14 = vmax.f32 %v57_v11, -100.0 }
  0x19   :  { %v61_v16 = vmax.f32 %v59_v13, -100.0 }
  0x1a   :  { %v62_v18 = vsub.f32 %v52_v10, %v60_v14 }
  0x1b   :  { %v63_v19 = vsub.f32 %v53_v12, %v61_v16 }
  0x1c   :  { %v64_v20 = vmul.f32 %v62_v18, %v46_v15 }
  0x1d   :  { %v65_v21 = vmul.f32 %v63_v19, %v47_v17 }
  0x1e   :  { %v66_v22 = vadd.f32 %v64_v20, %v60_v14 }
  0x1f   :  { %v67_v23 = vadd.f32 %v65_v21, %v61_v16 }
  0x21   :  { %v68_v24 = vadd.f32 %v67_v23, %v66_v22 }
  0x23   :  { %70 = vst [vmem:[#allocation7] sm:$0xff] %v68_v24 }
  0x24   :  { %81 = dma.vmem_to_hbm [thread:$0]  %s77_s1, 128, %s79_s23, [#allocation4]  }
  0x25   :  { %178 = dma.done.wait [#allocation4], 128  }
  0x26   :  { %179 = vsyncadd [#allocation4], 4294967168 }
  0x27   :  { %86 = vsyncpa [#allocation3], 1 }
  0x28   :  { %87 = vsyncpa [#allocation6], 1 }
  0x29   :  { %88 = vsyncpa [#allocation4], 1 }

</bundles_post_ra>
